<compile_context>
chip_gen: v7x
topology: tpu7x:2x2x1
jax: 0.10.0
libtpu: 0.0.40
codegen_flags: <defaults>
</compile_context>

<pallas_src>
import math

import jax
import jax.numpy as jnp
import numpy as np
from jax import lax
from jax.experimental import pallas as pl
from jax.experimental.pallas import tpu as pltpu

# ----------------------------- config ---------------------------------------
B = 2          # batch
T = 8          # sequence length
C = 32         # n_embd
H = 4          # n_head
D = C // H     # head dim
BT = B * T     # folded (batch*seq) rows
HBT = H * BT   # folded (head * batch*seq) attention columns
EPS = 1e-5
NEG_INF = -1e30
SCALE = 1.0 / math.sqrt(D)


# ----------------------------- kernel helpers --------------------------------
def _layernorm(h, w, b):
    mu = jnp.mean(h, axis=-1, keepdims=True)
    hc = h - mu
    var = jnp.mean(hc * hc, axis=-1, keepdims=True)
    return hc * lax.rsqrt(var + EPS) * w + b


def _gelu_tanh(x):
    # GELU(approximate='tanh'), f32 math (v5e-safe)
    c = math.sqrt(2.0 / math.pi)
    return 0.5 * x * (1.0 + jnp.tanh(c * (x + 0.044715 * x * x * x)))


# ----------------------------- kernel ----------------------------------------
def block_kernel(x_ref,
                 ln1_w_ref, ln1_b_ref,
                 w_qkv_ref, b_qkv_ref,
                 w_o_ref, b_o_ref,
                 ln2_w_ref, ln2_b_ref,
                 w_fc_ref, b_fc_ref,
                 w_pr_ref, b_pr_ref,
                 hsel_ref, bias_ref,
                 out_ref):
    x = x_ref[...]                                            # (BT, C) f32

    # ---- ln_1 + fused QKV projection (bf16 MXU operands, f32 accumulation) --
    h = _layernorm(x, ln1_w_ref[...], ln1_b_ref[...])
    qkv = jnp.dot(h.astype(jnp.bfloat16), w_qkv_ref[...],
                  preferred_element_type=jnp.float32) + b_qkv_ref[...]

    q = qkv[:, 0 * C:1 * C].astype(jnp.bfloat16)              # 1/sqrt(D) pre-folded
    k = qkv[:, 1 * C:2 * C]                                   # (BT, C) f32
    v = qkv[:, 2 * C:3 * C]                                   # (BT, C) f32

    # Head-block-diagonal K / V: row segment hd keeps only head hd's channels.
    hsel = hsel_ref[...]                                      # (HBT, C) 0/1 f32
    kt = (jnp.concatenate([k] * H, axis=0) * hsel).astype(jnp.bfloat16)   # (HBT, C)
    vp = (jnp.concatenate([v] * H, axis=0) * hsel).astype(jnp.bfloat16)   # (HBT, C)

    # All-head attention scores in ONE MXU pass: (BT,C) x (HBT,C)^T -> (BT,HBT).
    s = lax.dot_general(q, kt, (((1,), (1,)), ((), ())),
                        preferred_element_type=jnp.float32)
    s = s + bias_ref[...]                                     # block-diag causal bias

    # Single masked softmax over the (BT, HBT) tile: one exp pass and one
    # normalize; per-head max/sum reductions over each BT-wide lane segment
    # are mutually independent (no serial chain between heads).
    m_parts = [jnp.max(s[:, g * BT:(g + 1) * BT], axis=-1, keepdims=True)
               for g in range(H)]
    m = jnp.concatenate([jnp.broadcast_to(mp, (BT, BT)) for mp in m_parts], axis=1)
    p = jnp.exp(s - m)                                        # one EUP pass, 64 lanes
    l_parts = [jnp.sum(p[:, g * BT:(g + 1) * BT], axis=-1, keepdims=True)
               for g in range(H)]
    l = jnp.concatenate([jnp.broadcast_to(lp, (BT, BT)) for lp in l_parts], axis=1)
    p = p * pl.reciprocal(l, approx=True)                     # EUP recip, off VALU path

    # Weighted values in ONE MXU pass; result is already head-concatenated
    # (BT, C) because V' is head-block-diagonal.  No VMEM scratch round-trip.
    y = jnp.dot(p.astype(jnp.bfloat16), vp, preferred_element_type=jnp.float32)

    att = jnp.dot(y.astype(jnp.bfloat16), w_o_ref[...],
                  preferred_element_type=jnp.float32) + b_o_ref[...]
    resid_mid = x + att

    # ---- ln_2 + MLP ----------------------------------------------------------
    h2 = _layernorm(resid_mid, ln2_w_ref[...], ln2_b_ref[...])
    ff = jnp.dot(h2.astype(jnp.bfloat16), w_fc_ref[...],
                 preferred_element_type=jnp.float32) + b_fc_ref[...]
    ff = _gelu_tanh(ff)                                       # f32 activation math
    mlp = jnp.dot(ff.astype(jnp.bfloat16), w_pr_ref[...],
                  preferred_element_type=jnp.float32) + b_pr_ref[...]

    out_ref[...] = resid_mid + mlp


# ----------------------------- init-time param prep ---------------------------
def prepare_params(params):
    """One-time prep: bf16 weight cast, SCALE folding, mask/bias constants."""
    (ln1_w, ln1_b, w_qkv, b_qkv, w_o, b_o,
     ln2_w, ln2_b, w_fc, b_fc, w_pr, b_pr) = params
    bf = jnp.bfloat16

    # Fold 1/sqrt(D) into the Q columns of the QKV projection.
    col_scale = np.ones((1, 3 * C), np.float32)
    col_scale[:, :C] = SCALE
    col_scale = jnp.asarray(col_scale)
    w_qkv = w_qkv * col_scale
    b_qkv = b_qkv * col_scale

    # Additive block-diagonal causal bias over the folded token axis:
    # query row i=(bi,ti); column r = hd*BT + j with key token j=(bj,tj).
    qi = np.arange(BT)[:, None]
    rr = np.arange(HBT)[None, :]
    kj = rr % BT
    valid = ((qi // T) == (kj // T)) & ((kj % T) <= (qi % T))
    bias = np.where(valid, 0.0, NEG_INF).astype(np.float32)          # (BT, HBT)

    # Head-selector 0/1 mask: hsel[r, c] = 1 iff (r // BT) == (c // D).
    hr = np.arange(HBT)[:, None]
    hc = np.arange(C)[None, :]
    hsel = ((hr // BT) == (hc // D)).astype(np.float32)              # (HBT, C)

    return (ln1_w, ln1_b,
            w_qkv.astype(bf), b_qkv,
            w_o.astype(bf), b_o,
            ln2_w, ln2_b,
            w_fc.astype(bf), b_fc,
            w_pr.astype(bf), b_pr,
            jnp.asarray(hsel), jnp.asarray(bias))


# ----------------------------- wrapper ----------------------------------------
@jax.jit
def gpt_block(x, prepared):
    x2 = x.reshape(BT, C)                 # fold batch into the matmul M dim
    n_in = 1 + len(prepared)
    out2 = pl.pallas_call(
        block_kernel,
        out_shape=jax.ShapeDtypeStruct((BT, C), jnp.float32),
        in_specs=[pl.BlockSpec(memory_space=pltpu.MemorySpace.VMEM)] * n_in,
        out_specs=pl.BlockSpec(memory_space=pltpu.MemorySpace.VMEM),
    )(x2, *prepared)
    return out2.reshape(B, T, C)


# ----------------------------- pure-JAX reference ------------------------------
def reference_block(x, params):
    (ln1_w, ln1_b, w_qkv, b_qkv, w_o, b_o,
     ln2_w, ln2_b, w_fc, b_fc, w_pr, b_pr) = params

    def ln(h, w, b):
        mu = jnp.mean(h, -1, keepdims=True)
        hc = h - mu
        var = jnp.mean(hc * hc, -1, keepdims=True)
        return hc / jnp.sqrt(var + EPS) * w + b

    h = ln(x, ln1_w[0], ln1_b[0])
    qkv = h @ w_qkv + b_qkv[0]
    q, k, v = jnp.split(qkv, 3, axis=-1)
    q = q.reshape(B, T, H, D).transpose(0, 2, 1, 3)
    k = k.reshape(B, T, H, D).transpose(0, 2, 1, 3)
    v = v.reshape(B, T, H, D).transpose(0, 2, 1, 3)
    s = jnp.einsum("bhtd,bhsd->bhts", q, k) / math.sqrt(D)
    mask = jnp.tril(jnp.ones((T, T), dtype=bool))
    s = jnp.where(mask, s, -jnp.inf)
    p = jax.nn.softmax(s, axis=-1)
    y = jnp.einsum("bhts,bhsd->bhtd", p, v).transpose(0, 2, 1, 3).reshape(B, T, C)
    y = y @ w_o + b_o[0]
    resid_mid = x + y

    h2 = ln(resid_mid, ln2_w[0], ln2_b[0])
    ff = h2 @ w_fc + b_fc[0]
    ff = 0.5 * ff * (1.0 + jnp.tanh(math.sqrt(2.0 / math.pi) * (ff + 0.044715 * ff ** 3)))
    return resid_mid + ff @ w_pr + b_pr[0]


# ----------------------------- main --------------------------------------------
if __name__ == "__main__":
    key = jax.random.PRNGKey(0)
    ks = jax.random.split(key, 16)

    x = jax.random.normal(ks[0], (B, T, C), dtype=jnp.float32)

    # Deterministic synthetic parameters (weights stored as [in, out]).
    params = (
        jnp.ones((1, C), jnp.float32),                                     # ln1_w
        jnp.zeros((1, C), jnp.float32),                                    # ln1_b
        jax.random.normal(ks[1], (C, 3 * C), jnp.float32) * 0.02,          # w_qkv
        jax.random.normal(ks[2], (1, 3 * C), jnp.float32) * 0.02,          # b_qkv
        jax.random.normal(ks[3], (C, C), jnp.float32) * 0.02,              # w_o
        jax.random.normal(ks[4], (1, C), jnp.float32) * 0.02,              # b_o
        jnp.ones((1, C), jnp.float32),                                     # ln2_w
        jnp.zeros((1, C), jnp.float32),                                    # ln2_b
        jax.random.normal(ks[5], (C, 4 * C), jnp.float32) * 0.02,          # w_fc
        jax.random.normal(ks[6], (1, 4 * C), jnp.float32) * 0.02,          # b_fc
        jax.random.normal(ks[7], (4 * C, C), jnp.float32) * 0.02,          # w_pr
        jax.random.normal(ks[8], (1, C), jnp.float32) * 0.02,              # b_pr
    )

    prepared = prepare_params(params)     # one-time init-side prep (bf16 cast etc.)

    out = gpt_block(x, prepared)
    out = jax.block_until_ready(out)

    ref = reference_block(x, params)
    # bf16 matmul operands + approx softmax reciprocal => compare at 2e-3.
    np.testing.assert_allclose(np.asarray(out), np.asarray(ref), rtol=2e-3, atol=2e-3)

    print("KERNEL_OK")
</pallas_src>

<mosaic_0001>
module attributes {stable_mosaic.version = 11 : i64} {
  func.func @block_kernel(%arg0: memref<16x32xf32, #tpu.memory_space<vmem>>, %arg1: memref<1x32xf32, #tpu.memory_space<vmem>>, %arg2: memref<1x32xf32, #tpu.memory_space<vmem>>, %arg3: memref<32x96xbf16, #tpu.memory_space<vmem>>, %arg4: memref<1x96xf32, #tpu.memory_space<vmem>>, %arg5: memref<32x32xbf16, #tpu.memory_space<vmem>>, %arg6: memref<1x32xf32, #tpu.memory_space<vmem>>, %arg7: memref<1x32xf32, #tpu.memory_space<vmem>>, %arg8: memref<1x32xf32, #tpu.memory_space<vmem>>, %arg9: memref<32x128xbf16, #tpu.memory_space<vmem>>, %arg10: memref<1x128xf32, #tpu.memory_space<vmem>>, %arg11: memref<128x32xbf16, #tpu.memory_space<vmem>>, %arg12: memref<1x32xf32, #tpu.memory_space<vmem>>, %arg13: memref<64x32xf32, #tpu.memory_space<vmem>>, %arg14: memref<16x64xf32, #tpu.memory_space<vmem>>, %arg15: memref<16x32xf32, #tpu.memory_space<vmem>>) attributes {dimension_semantics = [], scalar_prefetch = 0 : i64, scratch_operands = 0 : i64, tpu.core_type = #tpu.core_type<tc>} {
    %c0 = arith.constant 0 : index
    %c0_0 = arith.constant 0 : index
    %0 = vector.load %arg0[%c0, %c0_0] : memref<16x32xf32, #tpu.memory_space<vmem>>, vector<16x32xf32>
    %c0_1 = arith.constant 0 : index
    %c0_2 = arith.constant 0 : index
    %1 = vector.load %arg1[%c0_1, %c0_2] : memref<1x32xf32, #tpu.memory_space<vmem>>, vector<1x32xf32>
    %c0_3 = arith.constant 0 : index
    %c0_4 = arith.constant 0 : index
    %2 = vector.load %arg2[%c0_3, %c0_4] : memref<1x32xf32, #tpu.memory_space<vmem>>, vector<1x32xf32>
    %cst = arith.constant dense<0.000000e+00> : vector<16xf32>
    %3 = vector.multi_reduction <add>, %0, %cst [1] : vector<16x32xf32> to vector<16xf32>
    %4 = vector.shape_cast %3 : vector<16xf32> to vector<16x1xf32>
    %cst_5 = arith.constant 3.200000e+01 : f32
    %5 = vector.broadcast %cst_5 : f32 to vector<16x1xf32>
    %6 = arith.divf %4, %5 : vector<16x1xf32>
    %7 = vector.broadcast %6 : vector<16x1xf32> to vector<16x32xf32>
    %8 = arith.subf %0, %7 : vector<16x32xf32>
    %9 = arith.mulf %8, %8 : vector<16x32xf32>
    %cst_6 = arith.constant dense<0.000000e+00> : vector<16xf32>
    %10 = vector.multi_reduction <add>, %9, %cst_6 [1] : vector<16x32xf32> to vector<16xf32>
    %11 = vector.shape_cast %10 : vector<16xf32> to vector<16x1xf32>
    %cst_7 = arith.constant 3.200000e+01 : f32
    %12 = vector.broadcast %cst_7 : f32 to vector<16x1xf32>
    %13 = arith.divf %11, %12 : vector<16x1xf32>
    %cst_8 = arith.constant 9.99999974E-6 : f32
    %14 = vector.broadcast %cst_8 : f32 to vector<16x1xf32>
    %15 = arith.addf %13, %14 : vector<16x1xf32>
    %16 = math.rsqrt %15 : vector<16x1xf32>
    %17 = vector.broadcast %16 : vector<16x1xf32> to vector<16x32xf32>
    %18 = arith.mulf %8, %17 : vector<16x32xf32>
    %19 = vector.broadcast %1 : vector<1x32xf32> to vector<16x32xf32>
    %20 = arith.mulf %18, %19 : vector<16x32xf32>
    %21 = vector.broadcast %2 : vector<1x32xf32> to vector<16x32xf32>
    %22 = arith.addf %20, %21 : vector<16x32xf32>
    %23 = arith.truncf %22 : vector<16x32xf32> to vector<16x32xbf16>
    %c0_9 = arith.constant 0 : index
    %c0_10 = arith.constant 0 : index
    %24 = vector.load %arg3[%c0_9, %c0_10] : memref<32x96xbf16, #tpu.memory_space<vmem>>, vector<32x96xbf16>
    %cst_11 = arith.constant dense<0.000000e+00> : vector<16x96xf32>
    %25 = tpu.matmul %23, %24, %cst_11 {dimension_numbers = #tpu.dot_dimension_numbers<[1], [0], [0], [1], [0, 0, 1, 1], [], []>} : vector<16x32xbf16>, vector<32x96xbf16>, vector<16x96xf32> -> vector<16x96xf32>
    %c0_12 = arith.constant 0 : index
    %c0_13 = arith.constant 0 : index
    %26 = vector.load %arg4[%c0_12, %c0_13] : memref<1x96xf32, #tpu.memory_space<vmem>>, vector<1x96xf32>
    %27 = vector.broadcast %26 : vector<1x96xf32> to vector<16x96xf32>
    %28 = arith.addf %25, %27 : vector<16x96xf32>
    %29 = vector.extract_strided_slice %28 {offsets = [0, 0], sizes = [16, 32], strides = [1, 1]} : vector<16x96xf32> to vector<16x32xf32>
    %30 = arith.truncf %29 : vector<16x32xf32> to vector<16x32xbf16>
    %31 = vector.extract_strided_slice %28 {offsets = [0, 32], sizes = [16, 32], strides = [1, 1]} : vector<16x96xf32> to vector<16x32xf32>
    %32 = vector.extract_strided_slice %28 {offsets = [0, 64], sizes = [16, 32], strides = [1, 1]} : vector<16x96xf32> to vector<16x32xf32>
    %c0_14 = arith.constant 0 : index
    %c0_15 = arith.constant 0 : index
    %33 = vector.load %arg13[%c0_14, %c0_15] : memref<64x32xf32, #tpu.memory_space<vmem>>, vector<64x32xf32>
    %34 = tpu.concatenate %31, %31, %31, %31 in 0 : vector<16x32xf32>, vector<16x32xf32>, vector<16x32xf32>, vector<16x32xf32> -> vector<64x32xf32>
    %35 = arith.mulf %34, %33 : vector<64x32xf32>
    %36 = arith.truncf %35 : vector<64x32xf32> to vector<64x32xbf16>
    %37 = tpu.concatenate %32, %32, %32, %32 in 0 : vector<16x32xf32>, vector<16x32xf32>, vector<16x32xf32>, vector<16x32xf32> -> vector<64x32xf32>
    %38 = arith.mulf %37, %33 : vector<64x32xf32>
    %39 = arith.truncf %38 : vector<64x32xf32> to vector<64x32xbf16>
    %cst_16 = arith.constant dense<0.000000e+00> : vector<16x64xf32>
    %40 = tpu.matmul %30, %36, %cst_16 {dimension_numbers = #tpu.dot_dimension_numbers<[1], [1], [0], [0], [0, 0, 1, 0], [], []>} : vector<16x32xbf16>, vector<64x32xbf16>, vector<16x64xf32> -> vector<16x64xf32>
    %c0_17 = arith.constant 0 : index
    %c0_18 = arith.constant 0 : index
    %41 = vector.load %arg14[%c0_17, %c0_18] : memref<16x64xf32, #tpu.memory_space<vmem>>, vector<16x64xf32>
    %42 = arith.addf %40, %41 : vector<16x64xf32>
    %43 = vector.extract_strided_slice %42 {offsets = [0, 0], sizes = [16, 16], strides = [1, 1]} : vector<16x64xf32> to vector<16x16xf32>
    %cst_19 = arith.constant dense<0xFF800000> : vector<16xf32>
    %44 = vector.multi_reduction <maximumf>, %43, %cst_19 [1] : vector<16x16xf32> to vector<16xf32>
    %45 = vector.shape_cast %44 : vector<16xf32> to vector<16x1xf32>
    %46 = vector.extract_strided_slice %42 {offsets = [0, 16], sizes = [16, 16], strides = [1, 1]} : vector<16x64xf32> to vector<16x16xf32>
    %cst_20 = arith.constant dense<0xFF800000> : vector<16xf32>
    %47 = vector.multi_reduction <maximumf>, %46, %cst_20 [1] : vector<16x16xf32> to vector<16xf32>
    %48 = vector.shape_cast %47 : vector<16xf32> to vector<16x1xf32>
    %49 = vector.extract_strided_slice %42 {offsets = [0, 32], sizes = [16, 16], strides = [1, 1]} : vector<16x64xf32> to vector<16x16xf32>
    %cst_21 = arith.constant dense<0xFF800000> : vector<16xf32>
    %50 = vector.multi_reduction <maximumf>, %49, %cst_21 [1] : vector<16x16xf32> to vector<16xf32>
    %51 = vector.shape_cast %50 : vector<16xf32> to vector<16x1xf32>
    %52 = vector.extract_strided_slice %42 {offsets = [0, 48], sizes = [16, 16], strides = [1, 1]} : vector<16x64xf32> to vector<16x16xf32>
    %cst_22 = arith.constant dense<0xFF800000> : vector<16xf32>
    %53 = vector.multi_reduction <maximumf>, %52, %cst_22 [1] : vector<16x16xf32> to vector<16xf32>
    %54 = vector.shape_cast %53 : vector<16xf32> to vector<16x1xf32>
    %55 = vector.shape_cast %45 : vector<16x1xf32> to vector<16x1xf32>
    %56 = vector.broadcast %55 : vector<16x1xf32> to vector<16x16xf32>
    %57 = vector.shape_cast %48 : vector<16x1xf32> to vector<16x1xf32>
    %58 = vector.broadcast %57 : vector<16x1xf32> to vector<16x16xf32>
    %59 = vector.shape_cast %51 : vector<16x1xf32> to vector<16x1xf32>
    %60 = vector.broadcast %59 : vector<16x1xf32> to vector<16x16xf32>
    %61 = vector.shape_cast %54 : vector<16x1xf32> to vector<16x1xf32>
    %62 = vector.broadcast %61 : vector<16x1xf32> to vector<16x16xf32>
    %63 = tpu.concatenate %56, %58, %60, %62 in 1 : vector<16x16xf32>, vector<16x16xf32>, vector<16x16xf32>, vector<16x16xf32> -> vector<16x64xf32>
    %64 = arith.subf %42, %63 : vector<16x64xf32>
    %65 = math.exp %64 : vector<16x64xf32>
    %66 = vector.extract_strided_slice %65 {offsets = [0, 0], sizes = [16, 16], strides = [1, 1]} : vector<16x64xf32> to vector<16x16xf32>
    %cst_23 = arith.constant dense<0.000000e+00> : vector<16xf32>
    %67 = vector.multi_reduction <add>, %66, %cst_23 [1] : vector<16x16xf32> to vector<16xf32>
    %68 = vector.shape_cast %67 : vector<16xf32> to vector<16x1xf32>
    %69 = vector.extract_strided_slice %65 {offsets = [0, 16], sizes = [16, 16], strides = [1, 1]} : vector<16x64xf32> to vector<16x16xf32>
    %cst_24 = arith.constant dense<0.000000e+00> : vector<16xf32>
    %70 = vector.multi_reduction <add>, %69, %cst_24 [1] : vector<16x16xf32> to vector<16xf32>
    %71 = vector.shape_cast %70 : vector<16xf32> to vector<16x1xf32>
    %72 = vector.extract_strided_slice %65 {offsets = [0, 32], sizes = [16, 16], strides = [1, 1]} : vector<16x64xf32> to vector<16x16xf32>
    %cst_25 = arith.constant dense<0.000000e+00> : vector<16xf32>
    %73 = vector.multi_reduction <add>, %72, %cst_25 [1] : vector<16x16xf32> to vector<16xf32>
    %74 = vector.shape_cast %73 : vector<16xf32> to vector<16x1xf32>
    %75 = vector.extract_strided_slice %65 {offsets = [0, 48], sizes = [16, 16], strides = [1, 1]} : vector<16x64xf32> to vector<16x16xf32>
    %cst_26 = arith.constant dense<0.000000e+00> : vector<16xf32>
    %76 = vector.multi_reduction <add>, %75, %cst_26 [1] : vector<16x16xf32> to vector<16xf32>
    %77 = vector.shape_cast %76 : vector<16xf32> to vector<16x1xf32>
    %78 = vector.shape_cast %68 : vector<16x1xf32> to vector<16x1xf32>
    %79 = vector.broadcast %78 : vector<16x1xf32> to vector<16x16xf32>
    %80 = vector.shape_cast %71 : vector<16x1xf32> to vector<16x1xf32>
    %81 = vector.broadcast %80 : vector<16x1xf32> to vector<16x16xf32>
    %82 = vector.shape_cast %74 : vector<16x1xf32> to vector<16x1xf32>
    %83 = vector.broadcast %82 : vector<16x1xf32> to vector<16x16xf32>
    %84 = vector.shape_cast %77 : vector<16x1xf32> to vector<16x1xf32>
    %85 = vector.broadcast %84 : vector<16x1xf32> to vector<16x16xf32>
    %86 = tpu.concatenate %79, %81, %83, %85 in 1 : vector<16x16xf32>, vector<16x16xf32>, vector<16x16xf32>, vector<16x16xf32> -> vector<16x64xf32>
    %87 = tpu.reciprocal %86 {approx = true} : vector<16x64xf32> -> vector<16x64xf32>
    %88 = arith.mulf %65, %87 : vector<16x64xf32>
    %89 = arith.truncf %88 : vector<16x64xf32> to vector<16x64xbf16>
    %cst_27 = arith.constant dense<0.000000e+00> : vector<16x32xf32>
    %90 = tpu.matmul %89, %39, %cst_27 {dimension_numbers = #tpu.dot_dimension_numbers<[1], [0], [0], [1], [0, 0, 1, 1], [], []>} : vector<16x64xbf16>, vector<64x32xbf16>, vector<16x32xf32> -> vector<16x32xf32>
    %91 = arith.truncf %90 : vector<16x32xf32> to vector<16x32xbf16>
    %c0_28 = arith.constant 0 : index
    %c0_29 = arith.constant 0 : index
    %92 = vector.load %arg5[%c0_28, %c0_29] : memref<32x32xbf16, #tpu.memory_space<vmem>>, vector<32x32xbf16>
    %cst_30 = arith.constant dense<0.000000e+00> : vector<16x32xf32>
    %93 = tpu.matmul %91, %92, %cst_30 {dimension_numbers = #tpu.dot_dimension_numbers<[1], [0], [0], [1], [0, 0, 1, 1], [], []>} : vector<16x32xbf16>, vector<32x32xbf16>, vector<16x32xf32> -> vector<16x32xf32>
    %c0_31 = arith.constant 0 : index
    %c0_32 = arith.constant 0 : index
    %94 = vector.load %arg6[%c0_31, %c0_32] : memref<1x32xf32, #tpu.memory_space<vmem>>, vector<1x32xf32>
    %95 = vector.broadcast %94 : vector<1x32xf32> to vector<16x32xf32>
    %96 = arith.addf %93, %95 : vector<16x32xf32>
    %97 = arith.addf %0, %96 : vector<16x32xf32>
    %c0_33 = arith.constant 0 : index
    %c0_34 = arith.constant 0 : index
    %98 = vector.load %arg7[%c0_33, %c0_34] : memref<1x32xf32, #tpu.memory_space<vmem>>, vector<1x32xf32>
    %c0_35 = arith.constant 0 : index
    %c0_36 = arith.constant 0 : index
    %99 = vector.load %arg8[%c0_35, %c0_36] : memref<1x32xf32, #tpu.memory_space<vmem>>, vector<1x32xf32>
    %cst_37 = arith.constant dense<0.000000e+00> : vector<16xf32>
    %100 = vector.multi_reduction <add>, %97, %cst_37 [1] : vector<16x32xf32> to vector<16xf32>
    %101 = vector.shape_cast %100 : vector<16xf32> to vector<16x1xf32>
    %cst_38 = arith.constant 3.200000e+01 : f32
    %102 = vector.broadcast %cst_38 : f32 to vector<16x1xf32>
    %103 = arith.divf %101, %102 : vector<16x1xf32>
    %104 = vector.broadcast %103 : vector<16x1xf32> to vector<16x32xf32>
    %105 = arith.subf %97, %104 : vector<16x32xf32>
    %106 = arith.mulf %105, %105 : vector<16x32xf32>
    %cst_39 = arith.constant dense<0.000000e+00> : vector<16xf32>
    %107 = vector.multi_reduction <add>, %106, %cst_39 [1] : vector<16x32xf32> to vector<16xf32>
    %108 = vector.shape_cast %107 : vector<16xf32> to vector<16x1xf32>
    %cst_40 = arith.constant 3.200000e+01 : f32
    %109 = vector.broadcast %cst_40 : f32 to vector<16x1xf32>
    %110 = arith.divf %108, %109 : vector<16x1xf32>
    %cst_41 = arith.constant 9.99999974E-6 : f32
    %111 = vector.broadcast %cst_41 : f32 to vector<16x1xf32>
    %112 = arith.addf %110, %111 : vector<16x1xf32>
    %113 = math.rsqrt %112 : vector<16x1xf32>
    %114 = vector.broadcast %113 : vector<16x1xf32> to vector<16x32xf32>
    %115 = arith.mulf %105, %114 : vector<16x32xf32>
    %116 = vector.broadcast %98 : vector<1x32xf32> to vector<16x32xf32>
    %117 = arith.mulf %115, %116 : vector<16x32xf32>
    %118 = vector.broadcast %99 : vector<1x32xf32> to vector<16x32xf32>
    %119 = arith.addf %117, %118 : vector<16x32xf32>
    %120 = arith.truncf %119 : vector<16x32xf32> to vector<16x32xbf16>
    %c0_42 = arith.constant 0 : index
    %c0_43 = arith.constant 0 : index
    %121 = vector.load %arg9[%c0_42, %c0_43] : memref<32x128xbf16, #tpu.memory_space<vmem>>, vector<32x128xbf16>
    %cst_44 = arith.constant dense<0.000000e+00> : vector<16x128xf32>
    %122 = tpu.matmul %120, %121, %cst_44 {dimension_numbers = #tpu.dot_dimension_numbers<[1], [0], [0], [1], [0, 0, 1, 1], [], []>} : vector<16x32xbf16>, vector<32x128xbf16>, vector<16x128xf32> -> vector<16x128xf32>
    %c0_45 = arith.constant 0 : index
    %c0_46 = arith.constant 0 : index
    %123 = vector.load %arg10[%c0_45, %c0_46] : memref<1x128xf32, #tpu.memory_space<vmem>>, vector<1x128xf32>
    %124 = vector.broadcast %123 : vector<1x128xf32> to vector<16x128xf32>
    %125 = arith.addf %122, %124 : vector<16x128xf32>
    %cst_47 = arith.constant 5.000000e-01 : f32
    %126 = vector.broadcast %cst_47 : f32 to vector<16x128xf32>
    %127 = arith.mulf %126, %125 : vector<16x128xf32>
    %cst_48 = arith.constant 4.471500e-02 : f32
    %128 = vector.broadcast %cst_48 : f32 to vector<16x128xf32>
    %129 = arith.mulf %128, %125 : vector<16x128xf32>
    %130 = arith.mulf %129, %125 : vector<16x128xf32>
    %131 = arith.mulf %130, %125 : vector<16x128xf32>
    %132 = arith.addf %125, %131 : vector<16x128xf32>
    %cst_49 = arith.constant 0.797884583 : f32
    %133 = vector.broadcast %cst_49 : f32 to vector<16x128xf32>
    %134 = arith.mulf %133, %132 : vector<16x128xf32>
    %135 = math.tanh %134 : vector<16x128xf32>
    %cst_50 = arith.constant 1.000000e+00 : f32
    %136 = vector.broadcast %cst_50 : f32 to vector<16x128xf32>
    %137 = arith.addf %136, %135 : vector<16x128xf32>
    %138 = arith.mulf %127, %137 : vector<16x128xf32>
    %139 = arith.truncf %138 : vector<16x128xf32> to vector<16x128xbf16>
    %c0_51 = arith.constant 0 : index
    %c0_52 = arith.constant 0 : index
    %140 = vector.load %arg11[%c0_51, %c0_52] : memref<128x32xbf16, #tpu.memory_space<vmem>>, vector<128x32xbf16>
    %cst_53 = arith.constant dense<0.000000e+00> : vector<16x32xf32>
    %141 = tpu.matmul %139, %140, %cst_53 {dimension_numbers = #tpu.dot_dimension_numbers<[1], [0], [0], [1], [0, 0, 1, 1], [], []>} : vector<16x128xbf16>, vector<128x32xbf16>, vector<16x32xf32> -> vector<16x32xf32>
    %c0_54 = arith.constant 0 : index
    %c0_55 = arith.constant 0 : index
    %142 = vector.load %arg12[%c0_54, %c0_55] : memref<1x32xf32, #tpu.memory_space<vmem>>, vector<1x32xf32>
    %143 = vector.broadcast %142 : vector<1x32xf32> to vector<16x32xf32>
    %144 = arith.addf %141, %143 : vector<16x32xf32>
    %145 = arith.addf %97, %144 : vector<16x32xf32>
    %c0_56 = arith.constant 0 : index
    %c0_57 = arith.constant 0 : index
    %146 = vector.load %arg15[%c0_56, %c0_57] : memref<16x32xf32, #tpu.memory_space<vmem>>, vector<16x32xf32>
    tpu.vector_store %arg15[%c0_56, %c0_57], %145 {strides = array<i32>} : memref<16x32xf32, #tpu.memory_space<vmem>>, vector<16x32xf32>,
    return
  }
}

</mosaic_0001>

<bundles_post_ra>
// kernel: gpt_block.1
= control target key start
LH: loop header
LB: loop body
LE: loop exit
PB: predicated region body
PF: predicated region fallthrough
CT: control target
= control target key end

     0   :  { %vm56_vm0 = vcmask 261120   ;;  %s1392_s0 = inlined_call_operand.vmem [shape: f32[16,32], index: 0, kind: input, shape index: {}]   ;;  %s1393_s1 = inlined_call_operand.vmem [shape: f32[1,32], index: 1, kind: input, shape index: {}]   ;;  %s1394_s2 = inlined_call_operand.vmem [shape: f32[1,32], index: 2, kind: input, shape index: {}]   ;;  %s1395_s3 = inlined_call_operand.vmem [shape: bf16[32,96], index: 3, kind: input, shape index: {}]   ;;  %s1396_s4 = inlined_call_operand.vmem [shape: f32[1,96], index: 4, kind: input, shape index: {}]   ;;  %s1397_s5 = inlined_call_operand.vmem [shape: bf16[32,32], index: 5, kind: input, shape index: {}]   ;;  %s1398_s6 = inlined_call_operand.vmem [shape: f32[1,32], index: 6, kind: input, shape index: {}]   ;;  %s1399_s7 = inlined_call_operand.vmem [shape: f32[1,32], index: 7, kind: input, shape index: {}]   ;;  %s1400_s8 = inlined_call_operand.vmem [shape: f32[1,32], index: 8, kind: input, shape index: {}]   ;;  %s1401_s9 = inlined_call_operand.vmem [shape: bf16[32,128], index: 9, kind: input, shape index: {}]   ;;  %s1402_s10 = inlined_call_operand.vmem [shape: f32[1,128], index: 10, kind: input, shape index: {}]   ;;  %s1403_s11 = inlined_call_operand.vmem [shape: bf16[128,32], index: 11, kind: input, shape index: {}]   ;;  %s1404_s12 = inlined_call_operand.vmem [shape: f32[1,32], index: 12, kind: input, shape index: {}]   ;;  %s1405_s13 = inlined_call_operand.vmem [shape: f32[64,32], index: 13, kind: input, shape index: {}]   ;;  %s1406_s14 = inlined_call_operand.vmem [shape: f32[16,64], index: 14, kind: input, shape index: {}]   ;;  %s1407_s15 = inlined_call_operand.hbm [shape: f32[16,32], index: 15, kind: output, shape index: {}]  }
   0x1   :  { %v1101_v0 = vld [vmem:[%s1392_s0] sm:$0xff]  ;;  %v1106_v1 = vld [vmem:[%s1392_s0 + $0x8] sm:$0xff] }
   0x2   :  { %v57_v2 = vsel %vm56_vm0, %v1101_v0, 0.0  ;;  %v60_v3 = vsel %vm56_vm0, %v1106_v1, 0.0 }
   0x3   :  { %58 = vadd.xlane.f32.xlu0 %v57_v2 }
   0x7   :  { %61 = vadd.xlane.f32.xlu0 %v60_v3 }
   0x8   :  { %20 = vsyncpa [#allocation3], 0  ;;  %v950_v14 = vld [vmem:[%s1395_s3] sm:$0xff]   ;;  %v1008_v15 = vmov 0.0   ;;  %v951_v16 = vld [vmem:[%s1395_s3 + $0x8] sm:$0xff]   ;;  %vm1009_vm1 = vmmov 0  }
   0x9   :  { %872 = vmatprep.subr.bf16.mxu0 %v1008_v15  ;;  %880 = vmatprep.subr.bf16.mxu1 %v1008_v15  ;;  %v1133_v17 = vld [vmem:[%s1405_s13 + $0x8] sm:$0xff]  ;;  %v1138_v18 = vld [vmem:[%s1405_s13] sm:$0xff]  ;;  %s1010_s3 = smov 32   ;;  %v1145_v19 = vld [vmem:[%s1405_s13 + $0x10] sm:$0xff]  ;;  %vm327_vm2 = vcmask 130048   ;;  %vm334_vm3 = vcmask 261248  }
   0xa   :  { %873 = vmatpush3.bf16.msra.mxu0 %v950_v14  ;;  %876 = vmatprep.mubr.msk.bf16.mxu0 %vm1009_vm1, %v1008_v15  ;;  %v1150_v20 = vld [vmem:[%s1405_s13 + $0x20] sm:$0xff]  ;;  %v1157_v21 = vld [vmem:[%s1405_s13 + $0x18] sm:$0xff]  ;;  %v1162_v22 = vld [vmem:[%s1405_s13 + $0x30] sm:$0xff]  ;;  %vm341_vm4 = vcmask 392448   ;;  %vm348_vm5 = vcmask 523648   ;;  %vm359_vm6 = vcmask 392192  }
   0xb   :  { %874 = vmatprep.subr.bf16.mxu0 %v1008_v15  ;;  %888 = vmatprep.mubr.msk.bf16.mxu1 %vm1009_vm1, %v1008_v15  ;;  %v1169_v23 = vld [vmem:[%s1405_s13 + $0x28] sm:$0xff]  ;;  %v1175_v24 = vld [vmem:[%s1405_s13 + $0x38] sm:$0xff]  ;;  %v817_v33 = vld [vmem:[%s1393_s1] ss:$0 sm:$0xff]  ;;  %s1013_s16 = smov 112   ;;  %s1014_s17 = smov 80  }
   0xc   :  { %v818_v37 = vld [vmem:[%s1394_s2] ss:$0 sm:$0xff]  ;;  %s1011_s2 = smov 96   ;;  %vm439_vm7 = vcmask 523264   ;;  %s1015_s22 = smov [#allocation2]  }
   0xd   :  { %v819_v46 = vld [vmem:[%s1396_s4] ss:$0 sm:$0xff] }
   0xe   :  { %875 = vmatpush3.bf16.msra.mxu0 %v951_v16 }
   0xf   :  { %892 = vmatprep.subr.bf16.mxu0 %v1008_v15 }
  0x1d   :  { %185 = vrot.lane.b32.xlu0 %v1138_v18, %s1010_s3 }
  0x21   :  { %193 = vrot.lane.b32.xlu0 %v1150_v20, %s1010_s3 }
  0x25   :  { %197 = vrot.lane.b32.xlu0 %v1162_v22, %s1010_s3 }
  0x90   :  { %v59_v4 = vpop.xlane.xlu0 %58 }
  0x91   :  { %v64_v5 = vmul.f32 0.03125, %v59_v4 }
  0x93   :  { %v66_v6 = vsub.f32 %v1101_v0, %v64_v5 }
  0x94   :  { %v62_v7 = vpop.xlane.xlu0 %61 }
  0x95   :  { %v65_v8 = vmul.f32 0.03125, %v62_v7  ;;  %v68_v9 = vmul.f32 %v66_v6, %v66_v6 }
  0x97   :  { %v67_v10 = vsub.f32 %v1106_v1, %v65_v8  ;;  %v70_v11 = vsel %vm56_vm0, %v68_v9, 0.0 }
  0x98   :  { %71 = vadd.xlane.f32.xlu1 %v70_v11  ;;  %v186_v45 = vpop.permute.xlu0 %185 }
  0x99   :  { %v69_v12 = vmul.f32 %v67_v10, %v67_v10 }
  0x9b   :  { %v73_v13 = vsel %vm56_vm0, %v69_v12, 0.0 }
  0x9c   :  { %74 = vadd.xlane.f32.xlu1 %v73_v13  ;;  %v194_v48 = vpop.permute.xlu0 %193 }
  0xa0   :  { %v198_v60 = vpop.permute.xlu0 %197 }
  0xad   :  { %187 = vrot.lane.b32.xlu1 %v1133_v17, %s1010_s3 }
  0xb1   :  { %189 = vrot.lane.b32.xlu1 %v1145_v19, %s1010_s3 }
  0xb5   :  { %191 = vrot.lane.b32.xlu1 %v1157_v21, %s1010_s3 }
  0xb9   :  { %195 = vrot.lane.b32.xlu1 %v1169_v23, %s1010_s3 }
  0xbd   :  { %199 = vrot.lane.b32.xlu1 %v1175_v24, %s1010_s3 }
 0x125   :  { %v72_v25 = vpop.xlane.xlu1 %71 }
 0x126   :  { %v76_v26 = vmul.f32 0.03125, %v72_v25  ;;  %v257_v25 = vld [vmem:[%s1406_s14] sm:$0xff] }
 0x128   :  { %v78_v27 = vadd.f32 1e-05, %v76_v26 }
 0x129   :  { %v75_v28 = vpop.xlane.xlu1 %74 }
 0x12a   :  { %964 = vrsqrt.f32 %v78_v27  ;;  %v77_v29 = vmul.f32 0.03125, %v75_v28  ;;  %v258_v27 = vld [vmem:[%s1406_s14 + $0x8] sm:$0xff]  ;;  %s1012_s14 = smov 64  }
 0x12c   :  { %v79_v30 = vadd.f32 1e-05, %v77_v29 }
 0x12d   :  { %v188_v42 = vpop.permute.xlu1 %187 }
 0x12e   :  { %966 = vrsqrt.f32 %v79_v30 }
 0x131   :  { %v190_v43 = vpop.permute.xlu1 %189 }
 0x134   :  { %v965_v31 = vpop.eup %964 }
 0x135   :  { %v82_v32 = vmul.f32 %v965_v31, %v66_v6  ;;  %v192_v44 = vpop.permute.xlu1 %191 }
 0x137   :  { %v90_v36 = vmul.f32 %v817_v33, %v82_v32 }
 0x138   :  { %v967_v34 = vpop.eup %966 }
 0x139   :  { %v83_v35 = vmul.f32 %v967_v34, %v67_v10  ;;  %v98_v39 = vadd.f32 %v818_v37, %v90_v36  ;;  %v196_v47 = vpop.permute.xlu1 %195 }
 0x13b   :  { %v91_v38 = vmul.f32 %v817_v33, %v83_v35 }
 0x13d   :  { %v99_v40 = vadd.f32 %v818_v37, %v91_v38  ;;  %v200_v55 = vpop.permute.xlu1 %199 }
 0x13f   :  { %v100_v41 = vpack.c.bf16 %v99_v40, %v98_v39 }
 0x141   :  { %877 = vmatmul.mubr.msk.bf16.vlgmr.msra.gmra.mrb[0].mxu0 %vm56_vm0, %v100_v41 }
 0x142   :  { %900 = vmatprep.mubr.msk.bf16.mxu0 %vm1009_vm1, %v1008_v15 }
 0x214   :  { %v161_v49 = vpop.f32.mrb[0].mxu0 }
 0x215   :  { %v1190_v50 = vadd.f32 %v819_v46, %v161_v49  ;;  %v878_v51 = vpop.f32.mrb[1].mxu0 }
 0x216   :  { %v164_v52 = vpop.f32.mrb[2].mxu0 }
 0x217   :  { %v1192_v53 = vadd.f32 %v819_v46, %v164_v52  ;;  %v879_v54 = vpop.f32.mrb[3].mxu0  ;;  %v211_v56 = vmul.f32 %v190_v43, %v1190_v50  ;;  %v209_v58 = vmul.f32 %v186_v45, %v1190_v50  ;;  %v215_v3 = vmul.f32 %v198_v60, %v1190_v50 }
 0x218   :  { %v213_v4 = vmul.f32 %v194_v48, %v1190_v50 }
 0x219   :  { %v212_v57 = vmul.f32 %v192_v44, %v1192_v53  ;;  %v210_v59 = vmul.f32 %v188_v42, %v1192_v53  ;;  %v216_v61 = vmul.f32 %v200_v55, %v1192_v53  ;;  %v214_v2 = vmul.f32 %v196_v47, %v1192_v53 }
 0x21a   :  { %v168_v16 = vpack.c.bf16 %v1192_v53, %v1190_v50 }
 0x21b   :  { %v218_v62 = vpack.c.bf16 %v212_v57, %v211_v56  ;;  %v217_v63 = vpack.c.bf16 %v210_v59, %v209_v58  ;;  %v220_v5 = vpack.c.bf16 %v216_v61, %v215_v3  ;;  %v219_v6 = vpack.c.bf16 %v214_v2, %v213_v4 }
 0x21d   :  { %265 = vrot.lane.b32.xlu1 %v218_v62, %s1011_s2  ;;  %263 = vrot.lane.b32.xlu0 %v217_v63, %s1011_s2 }
 0x221   :  { %267 = vrot.lane.b32.xlu0 %v219_v6, %s1011_s2  ;;  %269 = vrot.lane.b32.xlu1 %v220_v5, %s1011_s2 }
 0x28f   :  { %v264_v7 = vpop.permute.xlu0 %263  ;;  %v266_v9 = vpop.permute.xlu1 %265 }
 0x290   :  { %v275_v8 = vsel %vm56_vm0, %v264_v7, 0  ;;  %v278_v10 = vsel %vm56_vm0, %v266_v9, 0 }
 0x291   :  { %881 = vmatpush3.bf16.xpose.msra.mxu1 %v275_v8 }
 0x292   :  { %882 = vmatprep.subr.bf16.mxu1 %v1008_v15 }
 0x293   :  { %v268_v11 = vpop.permute.xlu0 %267  ;;  %v270_v13 = vpop.permute.xlu1 %269 }
 0x294   :  { %v281_v12 = vsel %vm56_vm0, %v268_v11, 0  ;;  %v284_v14 = vsel %vm56_vm0, %v270_v13, 0 }
 0x299   :  { %883 = vmatpush3.bf16.xpose.msra.mxu1 %v278_v10 }
 0x29a   :  { %884 = vmatprep.subr.bf16.mxu1 %v1008_v15 }
 0x2a1   :  { %885 = vmatpush3.bf16.xpose.msra.mxu1 %v281_v12 }
 0x2a2   :  { %886 = vmatprep.subr.bf16.mxu1 %v1008_v15 }
 0x2a9   :  { %887 = vmatpush3.bf16.xpose.msra.mxu1 %v284_v14 }
 0x2aa   :  { %920 = vmatprep.subr.bf16.mxu1 %v1008_v15 }
 0x2b0   :  { %889 = vmatmul.mubr.msk.bf16.vlgmr.msra.gmra.mrb[0].mxu1 %vm56_vm0, %v168_v16 }
 0x2b1   :  { %936 = vmatprep.mubr.msk.bf16.mxu1 %vm1009_vm1, %v1008_v15 }
 0x383   :  { %v320_v26 = vpop.f32.mrb[0].mxu1 }
 0x384   :  { %v321_v28 = vadd.f32 %v320_v26, %v257_v25  ;;  %v890_v29 = vpop.f32.mrb[1].mxu1 }
 0x385   :  { %v323_v30 = vpop.f32.mrb[2].mxu1 }
 0x386   :  { %v324_v31 = vadd.f32 %v323_v30, %v258_v27  ;;  %v891_v32 = vpop.f32.mrb[3].mxu1  ;;  %v328_v33 = vsel %vm327_vm2, %v321_v28, -inf  ;;  %v335_v35 = vsel %vm334_vm3, %v321_v28, -inf  ;;  %v342_v37 = vsel %vm341_vm4, %v321_v28, -inf }
 0x387   :  { %329 = vmax.xlane.f32.xlu0 %v328_v33  ;;  %v349_v40 = vsel %vm348_vm5, %v321_v28, -inf }
 0x388   :  { %v331_v34 = vsel %vm327_vm2, %v324_v31, -inf  ;;  %v345_v36 = vsel %vm341_vm4, %v324_v31, -inf  ;;  %v352_v38 = vsel %vm348_vm5, %v324_v31, -inf  ;;  %v338_v39 = vsel %vm334_vm3, %v324_v31, -inf }
 0x389   :  { %332 = vmax.xlane.f32.xlu1 %v331_v34 }
 0x38b   :  { %336 = vmax.xlane.f32.xlu0 %v335_v35 }
 0x38d   :  { %346 = vmax.xlane.f32.xlu1 %v345_v36 }
 0x38f   :  { %343 = vmax.xlane.f32.xlu0 %v342_v37 }
 0x391   :  { %353 = vmax.xlane.f32.xlu1 %v352_v38 }
 0x393   :  { %339 = vmax.xlane.f32.xlu0 %v338_v39 }
 0x397   :  { %350 = vmax.xlane.f32.xlu0 %v349_v40 }
 0x3a2   :  { %223 = vrot.lane.b32.xlu1 %v1133_v17, %s1012_s14 }
 0x3a6   :  { %227 = vrot.lane.b32.xlu1 %v1157_v21, %s1012_s14 }
 0x3ad   :  { %221 = vrot.lane.b32.xlu0 %v1138_v18, %s1012_s14 }
 0x3b1   :  { %225 = vrot.lane.b32.xlu0 %v1145_v19, %s1012_s14 }
 0x414   :  { %v330_v41 = vpop.xlane.xlu0 %329 }
 0x416   :  { %v333_v42 = vpop.xlane.xlu1 %332 }
 0x418   :  { %v337_v43 = vpop.xlane.xlu0 %336 }
 0x419   :  { %v355_v48 = vsel %vm327_vm2, %v330_v41, %v337_v43 }
 0x41a   :  { %v347_v44 = vpop.xlane.xlu1 %346 }
 0x41c   :  { %v344_v45 = vpop.xlane.xlu0 %343 }
 0x41d   :  { %v357_v17 = vsel %vm56_vm0, %v355_v48, %v344_v45 }
 0x41e   :  { %v354_v46 = vpop.xlane.xlu1 %353 }
 0x420   :  { %v340_v47 = vpop.xlane.xlu0 %339 }
 0x421   :  { %v356_v21 = vsel %vm327_vm2, %v333_v42, %v340_v47 }
 0x422   :  { %v224_v51 = vpop.permute.xlu1 %223  ;;  %v358_v19 = vsel %vm56_vm0, %v356_v21, %v347_v44 }
 0x423   :  { %v246_v56 = vmul.f32 %v224_v51, %v1192_v53  ;;  %v361_v58 = vsel %vm359_vm6, %v358_v19, %v354_v46 }
 0x424   :  { %v351_v49 = vpop.xlane.xlu0 %350  ;;  %v363_v60 = vsub.f32 %v324_v31, %v361_v58 }
 0x425   :  { %v360_v18 = vsel %vm359_vm6, %v357_v17, %v351_v49 }
 0x426   :  { %v362_v52 = vsub.f32 %v321_v28, %v360_v18  ;;  %v366_v61 = vmul.f32 1.442695, %v363_v60  ;;  %v228_v2 = vpop.permute.xlu1 %227 }
 0x428   :  { %v364_v54 = vmul.f32 1.442695, %v362_v52  ;;  %v222_v55 = vpop.permute.xlu0 %221 }
 0x429   :  { %v245_v57 = vmul.f32 %v222_v55, %v1190_v50 }
 0x42a   :  { %968 = vpow2.f32 %v364_v54  ;;  %v952_v54 = vld [vmem:[%s1397_s5] sm:$0xff]  }
 0x42b   :  { %v253_v59 = vpack.c.bf16 %v246_v56, %v245_v57  ;;  %970 = vpow2.f32 %v366_v61  ;;  %v953_v56 = vld [vmem:[%s1397_s5 + $0x8] sm:$0xff]   ;;  %s806_s5 = sshll.u32 %s1015_s22, 4  ;;  %s807_s5 = int_to_ptr.vmem [resolvable:$true] %s806_s5 }
 0x42c   :  { %p989_p1 = scmp.lt.s32.totalorder %s807_s5, %s807_s5 }
 0x434   :  { %v1243_v62 = vpop.eup %968 }
 0x435   :  { %376 = vrot.lane.b32.xlu0 %v1243_v62, %s1013_s16  ;;  %388 = vrot.lane.b32.xlu1 %v1243_v62, %s1011_s2  ;;  %v1255_v63 = vpop.eup %970 }
 0x439   :  { %400 = vrot.lane.b32.xlu0 %v1243_v62, %s1014_s17  ;;  %231 = vrot.lane.b32.xlu1 %v1169_v23, %s1012_s14  ;;  %v368_v23 = vsel %vm327_vm2, %v1243_v62, 0.0 }
 0x43d   :  { %229 = vrot.lane.b32.xlu0 %v1150_v20, %s1012_s14  ;;  %235 = vrot.lane.b32.xlu1 %v1175_v24, %s1012_s14  ;;  %v371_v20 = vsel %vm327_vm2, %v1255_v63, 0.0  ;;  %v226_v24 = vpop.permute.xlu0 %225 }
 0x43e   :  { %v247_v3 = vmul.f32 %v226_v24, %v1190_v50 }
 0x441   :  { %233 = vrot.lane.b32.xlu0 %v1162_v22, %s1012_s14  ;;  %378 = vrot.lane.b32.xlu1 %v1255_v63, %s1013_s16  ;;  %v248_v22 = vmul.f32 %v228_v2, %v1192_v53 }
 0x443   :  { %v254_v4 = vpack.c.bf16 %v248_v22, %v247_v3 }
 0x445   :  { %390 = vrot.lane.b32.xlu1 %v1255_v63, %s1011_s2 }
 0x449   :  { %402 = vrot.lane.b32.xlu1 %v1255_v63, %s1014_s17 }
 0x460   :  { %369 = vadd.xlane.f32.xlu0 %v368_v23 }
 0x46d   :  { %372 = vadd.xlane.f32.xlu1 %v371_v20 }
 0x47e   :  { %429 = vrot.lane.b32.xlu1 %v254_v4, %s1012_s14 }
 0x4a7   :  { %v377_v5 = vpop.permute.xlu0 %376  ;;  %v389_v6 = vpop.permute.xlu1 %388 }
 0x4a8   :  { %v382_v7 = vsel %vm327_vm2, %v377_v5, 0.0  ;;  %v394_v10 = vsel %vm327_vm2, %v389_v6, 0.0 }
 0x4a9   :  { %383 = vadd.xlane.f32.xlu0 %v382_v7 }
 0x4ab   :  { %v401_v8 = vpop.permute.xlu0 %400  ;;  %v232_v9 = vpop.permute.xlu1 %231 }
 0x4ac   :  { %v250_v13 = vmul.f32 %v232_v9, %v1192_v53  ;;  %v406_v16 = vsel %vm327_vm2, %v401_v8, 0.0 }
 0x4ad   :  { %395 = vadd.xlane.f32.xlu0 %v394_v10 }
 0x4af   :  { %v230_v11 = vpop.permute.xlu0 %229  ;;  %v236_v12 = vpop.permute.xlu1 %235 }
 0x4b0   :  { %v249_v14 = vmul.f32 %v230_v11, %v1190_v50  ;;  %v252_v34 = vmul.f32 %v236_v12, %v1192_v53 }
 0x4b1   :  { %407 = vadd.xlane.f32.xlu0 %v406_v16  ;;  %v954_v16 = vld [vmem:[%s1401_s9] sm:$0xff]  }
 0x4b2   :  { %v255_v25 = vpack.c.bf16 %v250_v13, %v249_v14 }
 0x4b3   :  { %v379_v26 = vpop.permute.xlu1 %378  ;;  %v234_v32 = vpop.permute.xlu0 %233 }
 0x4b4   :  { %431 = vrot.lane.b32.xlu1 %v255_v25, %s1012_s14  ;;  %v385_v27 = vsel %vm327_vm2, %v379_v26, 0.0  ;;  %v251_v33 = vmul.f32 %v234_v32, %v1190_v50  ;;  %v955_v25 = vld [vmem:[%s1401_s9 + $0x8] sm:$0xff]  }
 0x4b5   :  { %386 = vadd.xlane.f32.xlu0 %v385_v27 }
 0x4b6   :  { %v256_v35 = vpack.c.bf16 %v252_v34, %v251_v33  ;;  %v829_v34 = vld [vmem:[%s1399_s7] ss:$0 sm:$0xff] }
 0x4b7   :  { %v391_v28 = vpop.permute.xlu1 %390 }
 0x4b8   :  { %v397_v29 = vsel %vm327_vm2, %v391_v28, 0.0 }
 0x4bb   :  { %v403_v30 = vpop.permute.xlu1 %402 }
 0x4bc   :  { %v409_v31 = vsel %vm327_vm2, %v403_v30, 0.0 }
 0x4cb   :  { %427 = vrot.lane.b32.xlu0 %v253_v59, %s1012_s14 }
 0x4d8   :  { %398 = vadd.xlane.f32.xlu1 %v397_v29 }
 0x4dc   :  { %410 = vadd.xlane.f32.xlu1 %v409_v31 }
 0x4ed   :  { %433 = vrot.lane.b32.xlu1 %v256_v35, %s1012_s14  ;;  %v370_v36 = vpop.xlane.xlu0 %369 }
 0x4fa   :  { %v373_v41 = vpop.xlane.xlu1 %372 }
 0x4fe   :  { %v430_v43 = vpop.permute.xlu1 %429 }
 0x526   :  { %v432_v50 = vpop.permute.xlu1 %431 }
 0x536   :  { %v384_v37 = vpop.xlane.xlu0 %383 }
 0x537   :  { %v412_v53 = vsel %vm327_vm2, %v370_v36, %v384_v37 }
 0x53a   :  { %v396_v38 = vpop.xlane.xlu0 %395 }
 0x53b   :  { %v414_v44 = vsel %vm56_vm0, %v412_v53, %v396_v38  ;;  %v830_v38 = vld [vmem:[%s1400_s8] ss:$0 sm:$0xff]  ;;  %v958_v53 = vld [vmem:[%s1403_s11 + $0x10] sm:$0xff]  }
 0x53e   :  { %v408_v39 = vpop.xlane.xlu0 %407 }
 0x53f   :  { %v416_v46 = vsel %vm359_vm6, %v414_v44, %v408_v39  ;;  %v959_v44 = vld [vmem:[%s1403_s11 + $0x18] sm:$0xff]  }
 0x540   :  { %972 = vrcp.f32 %v416_v46  ;;  %v961_v46 = vld [vmem:[%s1403_s11 + $0x28] sm:$0xff]  }
 0x542   :  { %v387_v40 = vpop.xlane.xlu0 %386 }
 0x543   :  { %v413_v47 = vsel %vm327_vm2, %v373_v41, %v387_v40 }
 0x546   :  { %v428_v42 = vpop.permute.xlu0 %427 }
 0x547   :  { %893 = vmatpush3.bf16.msra.mxu0 %v428_v42 }
 0x548   :  { %894 = vmatprep.subr.bf16.mxu0 %v1008_v15 }
 0x54a   :  { %v973_v18 = vpop.eup %972 }
 0x54b   :  { %895 = vmatpush3.bf16.msra.mxu0 %v430_v43  ;;  %v420_v52 = vmul.f32 %v973_v18, %v1243_v62  ;;  %v825_v62 = vld [vmem:[%s1398_s6] ss:$0 sm:$0xff]  ;;  %s984_s6 = scalar_lea.vmem %s807_s5, 256 }
 0x54c   :  { %896 = vmatprep.subr.bf16.mxu0 %v1008_v15  ;;  %v956_v43 = vld [vmem:[%s1403_s11] sm:$0xff]   ;;  %p985_p0 = scmp.ne.s32.totalorder %s807_s5, %s984_s6  ;;  %p990_p2 = scmp.lt.s32.totalorder %s984_s6, %s984_s6 }
 0x54d   :  { %921 = vmatpush3.bf16.msra.mxu1 %v956_v43 }
 0x54e   :  { %922 = vmatprep.subr.bf16.mxu1 %v1008_v15  ;;  %p991_p3 = por %p990_p2, %p989_p1 }
 0x54f   :  { %897 = vmatpush3.bf16.msra.mxu0 %v432_v50  ;;  %v957_v50 = vld [vmem:[%s1403_s11 + $0x8] sm:$0xff]  }
 0x550   :  { %898 = vmatprep.subr.bf16.mxu0 %v1008_v15  ;;  %p992_p4 = pnand %p991_p3, %p985_p0 }
 0x551   :  { %923 = vmatpush3.bf16.msra.mxu1 %v957_v50 }
 0x552   :  { %924 = vmatprep.subr.bf16.mxu1 %v1008_v15 }
 0x555   :  { %925 = vmatpush3.bf16.msra.mxu1 %v958_v53 }
 0x556   :  { %926 = vmatprep.subr.bf16.mxu1 %v1008_v15 }
 0x559   :  { %927 = vmatpush3.bf16.msra.mxu1 %v959_v44 }
 0x55a   :  { %928 = vmatprep.subr.bf16.mxu1 %v1008_v15 }
 0x565   :  { %v399_v45 = vpop.xlane.xlu1 %398 }
 0x566   :  { %v415_v48 = vsel %vm56_vm0, %v413_v47, %v399_v45  ;;  %v960_v45 = vld [vmem:[%s1403_s11 + $0x20] sm:$0xff]   ;;  %v962_v47 = vld [vmem:[%s1403_s11 + $0x30] sm:$0xff]  }
 0x567   :  { %929 = vmatpush3.bf16.msra.mxu1 %v960_v45 }
 0x568   :  { %930 = vmatprep.subr.bf16.mxu1 %v1008_v15 }
 0x569   :  { %v411_v17 = vpop.xlane.xlu1 %410 }
 0x56a   :  { %v417_v49 = vsel %vm359_vm6, %v415_v48, %v411_v17  ;;  %v963_v48 = vld [vmem:[%s1403_s11 + $0x38] sm:$0xff]   ;;  %v831_v17 = vld [vmem:[%s1402_s10] ss:$0 sm:$0xff] }
 0x56b   :  { %974 = vrcp.f32 %v417_v49  ;;  %931 = vmatpush3.bf16.msra.mxu1 %v961_v46 }
 0x56c   :  { %932 = vmatprep.subr.bf16.mxu1 %v1008_v15 }
 0x56d   :  { %v434_v21 = vpop.permute.xlu1 %433 }
 0x56e   :  { %899 = vmatpush3.bf16.msra.mxu0 %v434_v21 }
 0x56f   :  { %904 = vmatprep.subr.bf16.mxu0 %v1008_v15  ;;  %933 = vmatpush3.bf16.msra.mxu1 %v962_v47 }
 0x570   :  { %934 = vmatprep.subr.bf16.mxu1 %v1008_v15 }
 0x573   :  { %935 = vmatpush3.bf16.msra.mxu1 %v963_v48 }
 0x575   :  { %v975_v51 = vpop.eup %974 }
 0x576   :  { %v421_v19 = vmul.f32 %v975_v51, %v1255_v63 }
 0x578   :  { %v422_v55 = vpack.c.bf16 %v421_v19, %v420_v52 }
 0x57a   :  { %901 = vmatmul.mubr.msk.bf16.vlgmr.msra.gmra.mrb[4].mxu0 %vm439_vm7, %v422_v55 }
 0x57b   :  { %905 = vmatpush3.bf16.msra.mxu0 %v952_v54  ;;  %908 = vmatprep.mubr.msk.bf16.mxu0 %vm1009_vm1, %v1008_v15 }
 0x57c   :  { %906 = vmatprep.subr.bf16.mxu0 %v1008_v15 }
 0x57f   :  { %907 = vmatpush3.bf16.msra.mxu0 %v953_v56 }
 0x580   :  { %912 = vmatprep.subr.bf16.mxu0 %v1008_v15 }
 0x64d   :  { %v477_v57 = vpop.f32.mrb[4].mxu0 }
 0x64e   :  { %v902_v58 = vpop.f32.mrb[5].mxu0 }
 0x64f   :  { %v480_v59 = vpop.f32.mrb[6].mxu0 }
 0x650   :  { %v484_v60 = vpack.c.bf16 %v480_v59, %v477_v57  ;;  %v903_v61 = vpop.f32.mrb[7].mxu0 }
 0x652   :  { %909 = vmatmul.mubr.msk.bf16.vlgmr.msra.gmra.mrb[8].mxu0 %vm56_vm0, %v484_v60 }
 0x653   :  { %916 = vmatprep.mubr.msk.bf16.mxu0 %vm1009_vm1, %v1008_v15  ;;  %913 = vmatpush3.bf16.msra.mxu0 %v954_v16 }
 0x654   :  { %914 = vmatprep.subr.bf16.mxu0 %v1008_v15 }
 0x657   :  { %915 = vmatpush3.bf16.msra.mxu0 %v955_v25 }
 0x725   :  { %v545_v63 = vpop.f32.mrb[8].mxu0 }
 0x726   :  { %v546_v23 = vadd.f32 %v825_v62, %v545_v63  ;;  %v910_v20 = vpop.f32.mrb[9].mxu0 }
 0x727   :  { %v548_v24 = vpop.f32.mrb[10].mxu0 }
 0x728   :  { %v1312_v2 = vadd.f32 %v546_v23, %v1101_v0  ;;  %v549_v3 = vadd.f32 %v825_v62, %v548_v24  ;;  %v911_v22 = vpop.f32.mrb[11].mxu0 }
 0x72a   :  { %v1315_v4 = vadd.f32 %v549_v3, %v1106_v1  ;;  %v556_v5 = vsel %vm56_vm0, %v1312_v2, 0.0 }
 0x72b   :  { %557 = vadd.xlane.f32.xlu0 %v556_v5 }
 0x72c   :  { %v559_v6 = vsel %vm56_vm0, %v1315_v4, 0.0 }
 0x72d   :  { %560 = vadd.xlane.f32.xlu1 %v559_v6 }
 0x7b8   :  { %v558_v7 = vpop.xlane.xlu0 %557 }
 0x7b9   :  { %v562_v8 = vmul.f32 0.03125, %v558_v7 }
 0x7ba   :  { %v561_v9 = vpop.xlane.xlu1 %560 }
 0x7bb   :  { %v564_v10 = vsub.f32 %v1312_v2, %v562_v8  ;;  %v563_v0 = vmul.f32 0.03125, %v561_v9  ;;  %v835_v8 = vld [vmem:[%s1404_s12] ss:$0 sm:$0xff] }
 0x7bd   :  { %v565_v11 = vsub.f32 %v1315_v4, %v563_v0  ;;  %v566_v12 = vmul.f32 %v564_v10, %v564_v10 }
 0x7bf   :  { %v568_v1 = vsel %vm56_vm0, %v566_v12, 0.0  ;;  %v567_v13 = vmul.f32 %v565_v11, %v565_v11 }
 0x7c0   :  { %569 = vadd.xlane.f32.xlu0 %v568_v1 }
 0x7c1   :  { %v571_v14 = vsel %vm56_vm0, %v567_v13, 0.0 }
 0x7c4   :  { %572 = vadd.xlane.f32.xlu0 %v571_v14 }
 0x84d   :  { %v570_v26 = vpop.xlane.xlu0 %569 }
 0x84e   :  { %v574_v27 = vmul.f32 0.03125, %v570_v26 }
 0x850   :  { %v576_v28 = vadd.f32 1e-05, %v574_v27 }
 0x851   :  { %v573_v29 = vpop.xlane.xlu0 %572 }
 0x852   :  { %976 = vrsqrt.f32 %v576_v28  ;;  %v575_v30 = vmul.f32 0.03125, %v573_v29 }
 0x854   :  { %v577_v31 = vadd.f32 1e-05, %v575_v30 }
 0x856   :  { %978 = vrsqrt.f32 %v577_v31 }
 0x85c   :  { %v977_v32 = vpop.eup %976 }
 0x85d   :  { %v580_v33 = vmul.f32 %v977_v32, %v564_v10 }
 0x85f   :  { %v588_v36 = vmul.f32 %v829_v34, %v580_v33 }
 0x860   :  { %v979_v35 = vpop.eup %978 }
 0x861   :  { %v581_v37 = vmul.f32 %v979_v35, %v565_v11  ;;  %v596_v40 = vadd.f32 %v830_v38, %v588_v36 }
 0x863   :  { %v589_v39 = vmul.f32 %v829_v34, %v581_v37 }
 0x865   :  { %v597_v41 = vadd.f32 %v830_v38, %v589_v39 }
 0x867   :  { %v598_v42 = vpack.c.bf16 %v597_v41, %v596_v40 }
 0x869   :  { %917 = vmatmul.mubr.msk.bf16.vlgmr.msra.gmra.mrb[12].mxu0 %vm56_vm0, %v598_v42 }
 0x93c   :  { %v659_v49 = vpop.f32.mrb[12].mxu0 }
 0x93d   :  { %v660_v21 = vadd.f32 %v831_v17, %v659_v49  ;;  %v918_v18 = vpop.f32.mrb[13].mxu0 }
 0x93e   :  { %v662_v51 = vpop.f32.mrb[14].mxu0 }
 0x93f   :  { %v668_v52 = vmul.f32 0.044715, %v660_v21  ;;  %v663_v19 = vadd.f32 %v831_v17, %v662_v51  ;;  %v919_v54 = vpop.f32.mrb[15].mxu0  ;;  %v666_v24 = vmul.f32 0.5, %v660_v21 }
 0x941   :  { %v670_v55 = vmul.f32 %v668_v52, %v660_v21  ;;  %v669_v56 = vmul.f32 0.044715, %v663_v19  ;;  %v667_v3 = vmul.f32 0.5, %v663_v19 }
 0x943   :  { %v672_v57 = vmul.f32 %v670_v55, %v660_v21  ;;  %v671_v58 = vmul.f32 %v669_v56, %v663_v19 }
 0x945   :  { %v674_v59 = vadd.f32 %v672_v57, %v660_v21  ;;  %v673_v60 = vmul.f32 %v671_v58, %v663_v19 }
 0x947   :  { %v676_v61 = vmul.f32 0.7978846, %v674_v59  ;;  %v675_v15 = vadd.f32 %v673_v60, %v663_v19 }
 0x949   :  { %980 = vtanh.f32 %v676_v61  ;;  %v677_v62 = vmul.f32 0.7978846, %v675_v15 }
 0x94b   :  { %982 = vtanh.f32 %v677_v62 }
 0x953   :  { %v981_v63 = vpop.eup %980 }
 0x954   :  { %v680_v23 = vadd.f32 1.0, %v981_v63 }
 0x955   :  { %v983_v20 = vpop.eup %982 }
 0x956   :  { %v681_v22 = vadd.f32 1.0, %v983_v20  ;;  %v682_v5 = vmul.f32 %v680_v23, %v666_v24 }
 0x958   :  { %v683_v6 = vmul.f32 %v681_v22, %v667_v3 }
 0x95a   :  { %v684_v7 = vpack.c.bf16 %v683_v6, %v682_v5 }
 0x95c   :  { %937 = vmatmul.mubr.bf16.vlgmr.msra.gmra.mrb[4].mxu1 %v684_v7 }
 0xa2f   :  { %v790_v9 = vpop.f32.mrb[4].mxu1 }
 0xa30   :  { %v791_v10 = vadd.f32 %v835_v8, %v790_v9  ;;  %v938_v0 = vpop.f32.mrb[5].mxu1 }
 0xa31   :  { %v793_v11 = vpop.f32.mrb[6].mxu1 }
 0xa32   :  { %v797_v12 = vadd.f32 %v791_v10, %v1312_v2  ;;  %v794_v1 = vadd.f32 %v835_v8, %v793_v11  ;;  %v939_v13 = vpop.f32.mrb[7].mxu1 }
 0xa34   :  { %799 = vst.msk [vmem:[#allocation2] sm:$0xff] %vm56_vm0, %v797_v12  ;;  %v798_v14 = vadd.f32 %v794_v1, %v1315_v4 }
 0xa36   :  { %800 = vst.msk [vmem:[#allocation2 + $0x8] sm:$0xff] %vm56_vm0, %v798_v14 }
 0xa37   :  { %995 = shalt.err (!%p992_p4)
}
 0xa38   :  { %s996_s24 = scalar_lea.hbm %s1407_s15, 256 }
 0xa39   :  { %p997_p5 = scmp.ne.s32.totalorder %s1407_s15, %s996_s24  ;;  %p1000_p6 = scmp.lt.u32.totalorder %s996_s24, %s1407_s15 }
 0xa3b   :  { %p1002_p7 = pnand %p1000_p6, %p997_p5 }
 0xa3d   :  { %1005 = shalt.err (!%p1002_p7)
}
 0xa3e   :  { %s1016_s27 = smov 128   ;;  %s1017_s1 = smov 8  }
 0xa3f   :  { %812 = dma.vmem_to_hbm [thread:$0]  %s807_s5, 256, %s1407_s15, [#allocation3], %s1016_s27, %s1016_s27, %s1017_s1  }
 0xa40   :  { %1006 = dma.done.wait [#allocation3], 256  }
 0xa41   :  { %1007 = vsyncadd [#allocation3], 4294967040 }
 0xa42   :  { %816 = vsyncpa [#allocation3], 1 }

</bundles_post_ra>
